<compile_context>
chip_gen: v5e
topology: v5e:2x2
jax: 0.10.0
libtpu: 0.0.40
codegen_flags: <defaults>
</compile_context>

<pallas_src>
import functools

import jax
import jax.numpy as jnp
from jax.experimental import pallas as pl
from jax.experimental.pallas import tpu as pltpu

_LANE = 128
_SUBLANE = 8


def _vmem_budget():
    """(tile_budget_bytes, vmem_limit_bytes) derived from this chip's VMEM."""
    cap = 64 * 1024 * 1024  # conservative (v7x-sized) fallback
    try:
        info = pltpu.get_tpu_info()
        cap = int(getattr(info, "vmem_capacity_bytes", cap))
    except Exception:
        pass
    tile_budget = int(cap * 0.40)   # what the double-buffered blocks may use
    vmem_limit = int(cap * 0.70)    # scoped limit requested from the compiler
    return tile_budget, vmem_limit


def _pick_tile(total, per_unit_bytes, budget, align):
    """Largest tile (multiple of `align`) along an axis of length `total` whose
    pipelined VMEM footprint stays under `budget`. Returns (tile, padded_total)."""
    t = budget // max(per_unit_bytes, 1)
    if t >= total:
        return int(total), int(total)   # full extent: no (8,128) constraint / padding
    t = max(align, (t // align) * align)
    padded = ((total + t - 1) // t) * t
    return int(t), int(padded)


# ---------------------------------------------------------------------------
# kernels
# ---------------------------------------------------------------------------

def _kl_block(s, t, axis, inv_tau):
    """p_T * (log p_T - log_softmax(S)) with softmax along `axis`, f32 math."""
    s = s.astype(jnp.float32) * inv_tau
    t = t.astype(jnp.float32) * inv_tau

    t_max = jnp.max(t, axis=axis, keepdims=True)
    t_shift = t - t_max
    t_exp = jnp.exp(t_shift)
    t_sum = jnp.sum(t_exp, axis=axis, keepdims=True)
    p_t = t_exp * pl.reciprocal(t_sum, approx=False)
    log_p_t = t_shift - jnp.log(t_sum)

    s_max = jnp.max(s, axis=axis, keepdims=True)
    s_shift = s - s_max
    log_p_s = s_shift - jnp.log(jnp.sum(jnp.exp(s_shift), axis=axis, keepdims=True))

    return p_t * (log_p_t - log_p_s)


def _sum_kernel(s_ref, t_ref, out_ref, *, axis, inv_tau):
    """One (8,128) partial-sum tile per grid block (grid stays fully parallel)."""
    kl = _kl_block(s_ref[...], t_ref[...], axis, inv_tau)
    psum = jnp.sum(kl)
    r = jax.lax.broadcasted_iota(jnp.int32, out_ref.shape, 0)
    c = jax.lax.broadcasted_iota(jnp.int32, out_ref.shape, 1)
    out_ref[...] = jnp.where((r == 0) & (c == 0), psum, jnp.float32(0.0))


def _none_kernel(s_ref, t_ref, out_ref, *, axis, inv_tau, tau_sq):
    kl = _kl_block(s_ref[...], t_ref[...], axis, inv_tau)
    out_ref[...] = (tau_sq * kl).astype(out_ref.dtype)


# ---------------------------------------------------------------------------
# wrappers
# ---------------------------------------------------------------------------

def _kl_4d(preds_S, preds_T, tau, reduction):
    N, C, H, W = preds_S.shape
    HW = H * W
    # Free reshape: channels on sublanes, the large H*W axis on lanes.
    s3 = preds_S.reshape(N, C, HW)
    t3 = preds_T.reshape(N, C, HW)

    budget, vmem_limit = _vmem_budget()
    in_b = preds_S.dtype.itemsize
    out_b = preds_S.dtype.itemsize if reduction == "none" else 0
    # 2 pipeline buffers per streamed array, C sublanes per lane column.
    per_col = 2 * C * (2 * in_b + out_b)
    tile, padded_hw = _pick_tile(HW, per_col, budget, _LANE)

    if padded_hw != HW:
        pad = padded_hw - HW
        # zero logits -> identical uniform distributions -> exactly zero KL
        s3 = jnp.pad(s3, ((0, 0), (0, 0), (0, pad)))
        t3 = jnp.pad(t3, ((0, 0), (0, 0), (0, pad)))

    ghw = padded_hw // tile
    grid = (N, ghw)
    in_spec = pl.BlockSpec((1, C, tile), lambda n, i: (n, 0, i))
    cparams = pltpu.CompilerParams(
        dimension_semantics=("parallel", "parallel"),
        vmem_limit_bytes=vmem_limit,
    )

    if reduction == "none":
        kern = functools.partial(
            _none_kernel, axis=1,
            inv_tau=1.0 / float(tau), tau_sq=float(tau) * float(tau))
        out = pl.pallas_call(
            kern,
            out_shape=jax.ShapeDtypeStruct((N, C, padded_hw), preds_S.dtype),
            grid_spec=pltpu.PrefetchScalarGridSpec(
                num_scalar_prefetch=0,
                grid=grid,
                in_specs=[in_spec, in_spec],
                out_specs=pl.BlockSpec((1, C, tile), lambda n, i: (n, 0, i)),
            ),
            compiler_params=cparams,
        )(s3, t3)
        if padded_hw != HW:
            out = out[:, :, :HW]
        return out.reshape(N, C, H, W)

    kern = functools.partial(_sum_kernel, axis=1, inv_tau=1.0 / float(tau))
    partials = pl.pallas_call(
        kern,
        out_shape=jax.ShapeDtypeStruct((N * ghw * _SUBLANE, _LANE), jnp.float32),
        grid_spec=pltpu.PrefetchScalarGridSpec(
            num_scalar_prefetch=0,
            grid=grid,
            in_specs=[in_spec, in_spec],
            out_specs=pl.BlockSpec((_SUBLANE, _LANE), lambda n, i: (n * ghw + i, 0)),
        ),
        compiler_params=cparams,
    )(s3, t3)
    return jnp.sum(partials)


def _kl_2d(preds_S, preds_T, tau, reduction):
    Nr, C = preds_S.shape
    budget, vmem_limit = _vmem_budget()
    in_b = preds_S.dtype.itemsize
    out_b = preds_S.dtype.itemsize if reduction == "none" else 0
    per_row = 2 * C * (2 * in_b + out_b)
    tile, padded_rows = _pick_tile(Nr, per_row, budget, _SUBLANE)

    s2, t2 = preds_S, preds_T
    if padded_rows != Nr:
        pad = padded_rows - Nr
        s2 = jnp.pad(s2, ((0, pad), (0, 0)))
        t2 = jnp.pad(t2, ((0, pad), (0, 0)))

    grid_r = padded_rows // tile
    in_spec = pl.BlockSpec((tile, C), lambda i: (i, 0))
    cparams = pltpu.CompilerParams(
        dimension_semantics=("parallel",),
        vmem_limit_bytes=vmem_limit,
    )

    if reduction == "none":
        kern = functools.partial(
            _none_kernel, axis=-1,
            inv_tau=1.0 / float(tau), tau_sq=float(tau) * float(tau))
        out = pl.pallas_call(
            kern,
            out_shape=jax.ShapeDtypeStruct((padded_rows, C), preds_S.dtype),
            grid_spec=pltpu.PrefetchScalarGridSpec(
                num_scalar_prefetch=0,
                grid=(grid_r,),
                in_specs=[in_spec, in_spec],
                out_specs=pl.BlockSpec((tile, C), lambda i: (i, 0)),
            ),
            compiler_params=cparams,
        )(s2, t2)
        return out[:Nr]

    kern = functools.partial(_sum_kernel, axis=-1, inv_tau=1.0 / float(tau))
    partials = pl.pallas_call(
        kern,
        out_shape=jax.ShapeDtypeStruct((grid_r * _SUBLANE, _LANE), jnp.float32),
        grid_spec=pltpu.PrefetchScalarGridSpec(
            num_scalar_prefetch=0,
            grid=(grid_r,),
            in_specs=[in_spec, in_spec],
            out_specs=pl.BlockSpec((_SUBLANE, _LANE), lambda i: (i, 0)),
        ),
        compiler_params=cparams,
    )(s2, t2)
    return jnp.sum(partials)


def kl_divergence(preds_S, preds_T, mask=None, *, tau=1.0, reduction="batchmean"):
    """Pallas TPU implementation of KLDivergence.forward(preds_S, preds_T, mask)."""
    accept = {"none", "batchmean", "sum", "mean"}
    assert reduction in accept, f"unsupported reduction {reduction}"
    del mask  # the reference PyTorch forward ignores `mask`

    if preds_S.ndim == 4:
        res = _kl_4d(preds_S, preds_T, tau, reduction)
    elif preds_S.ndim == 2:
        res = _kl_2d(preds_S, preds_T, tau, reduction)
    else:
        raise ValueError(f"Expected (N, C, H, W) or (N, C), got {preds_S.shape}")

    if reduction == "none":
        return res

    total = res * (float(tau) ** 2)
    if reduction == "sum":
        return total
    if reduction == "batchmean":
        return total / preds_S.shape[0]
    # mean: divide by number of elements of the un-reduced output
    numel = 1
    for d in preds_S.shape:
        numel *= d
    return total / numel


def _reference(preds_S, preds_T, tau=1.0, reduction="batchmean"):
    """Pure-JAX reference matching torch.nn.functional semantics (softmax dim=1)."""
    p_t = jax.nn.softmax(preds_T / tau, axis=1)
    log_p_t = jax.nn.log_softmax(preds_T / tau, axis=1)
    log_p_s = jax.nn.log_softmax(preds_S / tau, axis=1)
    kl = p_t * (log_p_t - log_p_s)
    if reduction == "none":
        return (tau ** 2) * kl
    if reduction == "sum":
        return (tau ** 2) * jnp.sum(kl)
    if reduction == "batchmean":
        return (tau ** 2) * jnp.sum(kl) / preds_S.shape[0]
    return (tau ** 2) * jnp.sum(kl) / kl.size


if __name__ == "__main__":
    key = jax.random.PRNGKey(0)
    k1, k2, k3, k4 = jax.random.split(key, 4)

    # NCHW inputs, softmax over C (dim=1)
    N, C, H, W = 2, 4, 16, 16
    preds_S = jax.random.normal(k1, (N, C, H, W), dtype=jnp.float32)
    preds_T = jax.random.normal(k2, (N, C, H, W), dtype=jnp.float32)
    tau = 2.0

    loss = jax.block_until_ready(
        kl_divergence(preds_S, preds_T, tau=tau, reduction="batchmean"))
    ref = _reference(preds_S, preds_T, tau=tau, reduction="batchmean")
    assert jnp.allclose(loss, ref, rtol=1e-5, atol=1e-5), (loss, ref)

    loss_none = jax.block_until_ready(
        kl_divergence(preds_S, preds_T, tau=tau, reduction="none"))
    ref_none = _reference(preds_S, preds_T, tau=tau, reduction="none")
    assert jnp.allclose(loss_none, ref_none, rtol=1e-5, atol=1e-5)

    # (N, C) path
    s2 = jax.random.normal(k3, (8, 32), dtype=jnp.float32)
    t2 = jax.random.normal(k4, (8, 32), dtype=jnp.float32)
    loss2 = jax.block_until_ready(kl_divergence(s2, t2, tau=1.0, reduction="sum"))
    ref2 = _reference(s2, t2, tau=1.0, reduction="sum")
    assert jnp.allclose(loss2, ref2, rtol=1e-5, atol=1e-5), (loss2, ref2)

    print("KERNEL_OK")
</pallas_src>

<mosaic_0001>
module attributes {stable_mosaic.version = 11 : i64} {
  func.func @_sum_kernel(%arg0: i32, %arg1: i32, %arg2: memref<1x4x256xf32, #tpu.memory_space<vmem>>, %arg3: memref<1x4x256xf32, #tpu.memory_space<vmem>>, %arg4: memref<8x128xf32, #tpu.memory_space<vmem>>) attributes {dimension_semantics = [#tpu.dimension_semantics<parallel>, #tpu.dimension_semantics<parallel>], iteration_bounds = array<i64: 2, 1>, scalar_prefetch = 0 : i64, scratch_operands = 0 : i64, tpu.core_type = #tpu.core_type<tc>, window_params = [{transform_indices = @transform_0, window_bounds = array<i64: 1, 4, 256>}, {transform_indices = @transform_1, window_bounds = array<i64: 1, 4, 256>}, {transform_indices = @transform_2, window_bounds = array<i64: 8, 128>}]} {
    %c0 = arith.constant 0 : index
    %c0_0 = arith.constant 0 : index
    %c0_1 = arith.constant 0 : index
    %0 = vector.load %arg2[%c0, %c0_0, %c0_1] : memref<1x4x256xf32, #tpu.memory_space<vmem>>, vector<1x4x256xf32>
    %c0_2 = arith.constant 0 : index
    %c0_3 = arith.constant 0 : index
    %c0_4 = arith.constant 0 : index
    %1 = vector.load %arg3[%c0_2, %c0_3, %c0_4] : memref<1x4x256xf32, #tpu.memory_space<vmem>>, vector<1x4x256xf32>
    %cst = arith.constant 5.000000e-01 : f32
    %2 = vector.broadcast %cst : f32 to vector<1x4x256xf32>
    %3 = arith.mulf %0, %2 : vector<1x4x256xf32>
    %cst_5 = arith.constant 5.000000e-01 : f32
    %4 = vector.broadcast %cst_5 : f32 to vector<1x4x256xf32>
    %5 = arith.mulf %1, %4 : vector<1x4x256xf32>
    %cst_6 = arith.constant dense<0xFF800000> : vector<1x256xf32>
    %6 = vector.multi_reduction <maximumf>, %5, %cst_6 [1] : vector<1x4x256xf32> to vector<1x256xf32>
    %7 = vector.shape_cast %6 : vector<1x256xf32> to vector<1x1x256xf32>
    %8 = vector.broadcast %7 : vector<1x1x256xf32> to vector<1x4x256xf32>
    %9 = arith.subf %5, %8 : vector<1x4x256xf32>
    %10 = math.exp %9 : vector<1x4x256xf32>
    %cst_7 = arith.constant dense<0.000000e+00> : vector<1x256xf32>
    %11 = vector.multi_reduction <add>, %10, %cst_7 [1] : vector<1x4x256xf32> to vector<1x256xf32>
    %12 = vector.shape_cast %11 : vector<1x256xf32> to vector<1x1x256xf32>
    %13 = tpu.reciprocal %12 : vector<1x1x256xf32> -> vector<1x1x256xf32>
    %14 = vector.broadcast %13 : vector<1x1x256xf32> to vector<1x4x256xf32>
    %15 = arith.mulf %10, %14 : vector<1x4x256xf32>
    %16 = math.log %12 : vector<1x1x256xf32>
    %17 = vector.broadcast %16 : vector<1x1x256xf32> to vector<1x4x256xf32>
    %18 = arith.subf %9, %17 : vector<1x4x256xf32>
    %cst_8 = arith.constant dense<0xFF800000> : vector<1x256xf32>
    %19 = vector.multi_reduction <maximumf>, %3, %cst_8 [1] : vector<1x4x256xf32> to vector<1x256xf32>
    %20 = vector.shape_cast %19 : vector<1x256xf32> to vector<1x1x256xf32>
    %21 = vector.broadcast %20 : vector<1x1x256xf32> to vector<1x4x256xf32>
    %22 = arith.subf %3, %21 : vector<1x4x256xf32>
    %23 = math.exp %22 : vector<1x4x256xf32>
    %cst_9 = arith.constant dense<0.000000e+00> : vector<1x256xf32>
    %24 = vector.multi_reduction <add>, %23, %cst_9 [1] : vector<1x4x256xf32> to vector<1x256xf32>
    %25 = vector.shape_cast %24 : vector<1x256xf32> to vector<1x1x256xf32>
    %26 = math.log %25 : vector<1x1x256xf32>
    %27 = vector.broadcast %26 : vector<1x1x256xf32> to vector<1x4x256xf32>
    %28 = arith.subf %22, %27 : vector<1x4x256xf32>
    %29 = arith.subf %18, %28 : vector<1x4x256xf32>
    %30 = arith.mulf %15, %29 : vector<1x4x256xf32>
    %31 = vector.shape_cast %30 : vector<1x4x256xf32> to vector<1x1x4x256xf32>
    %cst_10 = arith.constant dense<0.000000e+00> : vector<1xf32>
    %32 = vector.multi_reduction <add>, %31, %cst_10 [1, 2, 3] : vector<1x1x4x256xf32> to vector<1xf32>
    %33 = vector.shape_cast %32 : vector<1xf32> to vector<1x1x1x1xf32>
    %34 = vector.extract %33[0, 0, 0, 0] : f32 from vector<1x1x1x1xf32>
    %35 = tpu.iota {dimensions = array<i32: 0>} : vector<8x128xi32>
    %36 = tpu.iota {dimensions = array<i32: 1>} : vector<8x128xi32>
    %c0_i32 = arith.constant 0 : i32
    %37 = vector.broadcast %c0_i32 : i32 to vector<8x128xi32>
    %38 = arith.cmpi eq, %35, %37 : vector<8x128xi32>
    %c0_i32_11 = arith.constant 0 : i32
    %39 = vector.broadcast %c0_i32_11 : i32 to vector<8x128xi32>
    %40 = arith.cmpi eq, %36, %39 : vector<8x128xi32>
    %41 = arith.andi %38, %40 : vector<8x128xi1>
    %cst_12 = arith.constant 0.000000e+00 : f32
    %42 = vector.broadcast %34 : f32 to vector<8x128xf32>
    %43 = vector.broadcast %cst_12 : f32 to vector<8x128xf32>
    %44 = arith.select %41, %42, %43 : vector<8x128xi1>, vector<8x128xf32>
    %c0_13 = arith.constant 0 : index
    %c0_14 = arith.constant 0 : index
    %45 = vector.load %arg4[%c0_13, %c0_14] : memref<8x128xf32, #tpu.memory_space<vmem>>, vector<8x128xf32>
    tpu.vector_store %arg4[%c0_13, %c0_14], %44 {strides = array<i32>} : memref<8x128xf32, #tpu.memory_space<vmem>>, vector<8x128xf32>,
    return
  }
  func.func @transform_0(%arg0: i32, %arg1: i32) -> (i32, i32, i32) {
    %c0_i32 = arith.constant 0 : i32
    %c0_i32_0 = arith.constant 0 : i32
    return %arg0, %c0_i32, %arg1 : i32, i32, i32
  }
  func.func @transform_1(%arg0: i32, %arg1: i32) -> (i32, i32, i32) {
    %c0_i32 = arith.constant 0 : i32
    %c0_i32_0 = arith.constant 0 : i32
    return %arg0, %c0_i32, %arg1 : i32, i32, i32
  }
  func.func @transform_2(%arg0: i32, %arg1: i32) -> (i32, i32) {
    %c1_i32 = arith.constant 1 : i32
    %0 = arith.muli %arg0, %c1_i32 : i32
    %1 = arith.addi %0, %arg1 : i32
    %c0_i32 = arith.constant 0 : i32
    %c0_i32_0 = arith.constant 0 : i32
    return %1, %c0_i32 : i32, i32
  }
}

</mosaic_0001>

<bundles_post_ra>
// kernel: tpu_custom_call.1
= control target key start
LH: loop header
LB: loop body
LE: loop exit
PB: predicated region body
PF: predicated region fallthrough
CT: control target
= control target key end

     0   :  { %7 = vsyncpa [#allocation3], 0  ;;  %s973_s0 = inlined_call_operand.hbm [shape: f32[2,4,256], index: 0, kind: input, shape index: {}]   ;;  %s974_s1 = inlined_call_operand.hbm [shape: f32[2,4,256], index: 1, kind: input, shape index: {}]   ;;  %s975_s2 = inlined_call_operand.hbm [shape: f32[16,128], index: 2, kind: output, shape index: {}]  }
   0x1   :  { %9 = vsyncpa [#allocation3 + $0x1], 0 }
   0x2   :  { %10 = vsyncpa [#allocation6], 0 }
   0x3   :  { %12 = vsyncpa [#allocation6 + $0x1], 0 }
   0x4   :  { %13 = vsyncpa [#allocation4], 0 }
   0x5   :  { %15 = vsyncpa [#allocation4 + $0x1], 0  ;;  %s805_s9 = smov 0   ;;  %s807_s10 = smov 0  }
   0x6   :  { %s809_s11 = smov 0   ;;  %s811_s12 = smov 0  }
   0x7   :  { %s813_s13 = smov 0   ;;  %s815_s14 = smov 0  }
   0x8 LB: > { %s537_s15 = sadd.s32 4294967295, %s788_s14   ;;  %s538_s16 = sadd.s32 4294967294, %s788_s14   ;;  %s788_s14 = sphi %s815_s14, %s21_s14   ;;  %s784_s13 = sphi %s813_s13, %s986_s13   ;;  %s780_s12 = sphi %s811_s12, %s985_s12   ;;  %s776_s11 = sphi %s809_s11, %s984_s11   ;;  %s772_s10 = sphi %s807_s10, %s983_s10   ;;  %s768_s9 = sphi %s805_s9, %s982_s9  }
   0x9   : > { %s33_s17 = sadd.s32 1, %s784_s13  ;;  %s42_s18 = sadd.s32 1, %s776_s11 }
   0xa   : > { %p35_p0 = scmp.ge.s32.totalorder %s33_s17, 2  ;;  %p49_p1 = scmp.ne.s32.totalorder %s776_s11, %s772_s10 }
   0xb   : > { %p50_p2 = scmp.eq.s32.totalorder %s788_s14, 0  ;;  %p55_p3 = scmp.ne.s32.totalorder %s772_s10, %s768_s9 }
   0xc   : > { %s988_s17 = smov (%p35_p0, %s33_s17), 0  ;;  %p56_p5 = scmp.eq.s32.totalorder %s537_s15, 0 }
   0xd   : > { %p846_p4 = por %p50_p2, %p49_p1  ;;  %s37_s20 = ssub.s32 %s784_s13, %s988_s17 }
   0xe   : > { %p109_p6 = scmp.eq.s32.totalorder %s537_s15, 1  ;;  %p40_p7 = scmp.eq.s32.totalorder %s37_s20, 0 }
   0xf   : > { %p852_p8 = por %p56_p5, %p55_p3  ;;  %p115_p10 = scmp.eq.s32.totalorder %s538_s16, 1 }
  0x10   : > { %p856_p9 = por %p109_p6, %p49_p1  ;;  %p540_p12 = scmp.ge.s32.totalorder %s788_s14, 2 }
  0x11   : > { %s861_s23 = scalar_select %p40_p7, %s776_s11, %s42_s18  }
  0x12   : > { %p863_p11 = por %p115_p10, %p55_p3  ;;  %p576_p13 = scmp.lt.s32.totalorder %s788_s14, 2 }
  0x13   : > { %s135_s25 = sand.u32 1, %s776_s11   ;;  %s555_s27 = sshll.u32 %s784_s13, 3 }
  0x14   : > { %s541_s26 = sshll.u32 %s135_s25, 3  ;;  %s146_s30 = scalar_lea.hbm %s973_s0, %s555_s27 }
  0x15   : > { %s139_s3 = scalar_lea.vmem [#allocation2], %s541_s26  ;;  %s148_s5 = sshll.u32 %s146_s30, 4  ;;  %s149_s5 = int_to_ptr.hbm [resolvable:$true] %s148_s5 }
  0x16   : > { %s150_s4 = sshll.u32 %s139_s3, 4  ;;  %p566_p0 = pnand %p576_p13, %p846_p4  ;;  %s151_s4 = int_to_ptr.vmem [resolvable:$true] %s150_s4 }
  0x17   : > { %p547_p1 = scmp.ge.s32.totalorder %s788_s14, 1  ;;  %p177_p2 = scmp.lt.s32.totalorder %s788_s14, 3 }
  0x18   : > { %s136_s6 = scalar_lea.sflag [#allocation3], %s135_s25  ;;  %s168_s15 = scalar_lea.hbm %s974_s1, %s555_s27 }
  0x19   : > { %568 = dma.hbm_to_vmem [thread:$0]  (!%p566_p0), %s149_s5, 128, %s151_s4, %s136_s6  }
  0x1a   : > { %p178_p3 = pnand %p547_p1, %p177_p2  ;;  %s161_s16 = scalar_lea.vmem [#allocation5], %s541_s26 }
  0x1b   : > { %s172_s18 = sshll.u32 %s161_s16, 4  ;;  %s170_s20 = sshll.u32 %s168_s15, 4  ;;  %s173_s18 = int_to_ptr.vmem [resolvable:$true] %s172_s18  ;;  %s171_s20 = int_to_ptr.hbm [resolvable:$true] %s170_s20 }
  0x1c   : > { %s158_s28 = scalar_lea.sflag [#allocation6], %s135_s25  ;;  %181 = sbr.rel (%p178_p3) target bundleno = 351 (0x15f), region = 28 }
  0x1d   : > { %571 = dma.hbm_to_vmem [thread:$0]  (!%p566_p0), %s171_s20, 128, %s173_s18, %s158_s28  }
  0x1e   : > { %s882_s19 = sand.u32 (!%p178_p3), 1, %s772_s10  }
  0x1f   : > { %s885_s29 = sshll.u32 (!%p178_p3), %s882_s19, 3  ;;  %s184_s30 = scalar_lea.sflag (!%p178_p3), [#allocation3], %s882_s19 }
  0x20   : > { %s187_s3 = scalar_lea.vmem (!%p178_p3), [#allocation2], %s885_s29 }
  0x21   : > { %755 = dma.done.wait (%p852_p8), %s184_s30, 128  }
  0x22   : > { %757 = vsyncadd (%p852_p8), %s184_s30, 4294967168  ;;  %s194_s25 = scalar_lea.sflag [#allocation6], %s882_s19  ;;  %s197_s26 = scalar_lea.vmem [#allocation5], %s885_s29 }
  0x23   : > { %759 = dma.done.wait (%p852_p8), %s194_s25, 128  }
  0x24   : > { %761 = vsyncadd (%p852_p8), %s194_s25, 4294967168  ;;  %v228_v0 = vld [vmem:[%s197_s26] sm:$0xff]  ;;  %vm237_vm0 = vcmask 1043456   ;;  %v227_v23 = vld [vmem:[%s187_s3] sm:$0xff]  ;;  %s552_s21 = sshll.u32 %s780_s12, 3  ;;  %s223_s6 = scalar_lea.vmem [#allocation7], %s885_s29 }
  0x25   : > { %v230_v1 = vmul.f32 0.5, %v228_v0  ;;  %v229_v24 = vmul.f32 0.5, %v227_v23  ;;  %s424_s5 = scalar_lea.hbm %s975_s2, %s552_s21  ;;  %s426_s7 = sshll.u32 %s223_s6, 4  ;;  %s427_s7 = int_to_ptr.vmem [resolvable:$true] %s426_s7 }
  0x26   : > { %s428_s8 = sshll.u32 %s424_s5, 4  ;;  %s413_s16 = scalar_lea.sflag [#allocation4], %s882_s19  ;;  %s429_s8 = int_to_ptr.hbm [resolvable:$true] %s428_s8 }
  0x27   : > { %232 = vst [vmem:[#allocation1] ss:$2 sm:$0xff] %v230_v1  ;;  %s716_s18 = sshra.s32 %s429_s8, 4  ;;  %s722_s29 = scalar_lea.hbm %s975_s2, 16  ;;  %s717_s18 = int_to_ptr.hbm [resolvable:$true] %s716_s18 }
  0x28   : > { %s718_s12 = scalar_lea.hbm %s717_s18, 8  ;;  %p723_p7 = scmp.lt.s32.totalorder %s717_s18, %s975_s2 }
  0x29   : > { %p719_p4 = scmp.ne.s32.totalorder %s717_s18, %s718_s12  ;;  %p724_p8 = scmp.lt.s32.totalorder %s722_s29, %s718_s12 }
  0x2b   : > { %p720_p5 = pnand %p719_p4, %p856_p9  ;;  %p725_p10 = por %p724_p8, %p723_p7 }
  0x2d   : > { %p721_p6 = pneg %p720_p5 }
  0x2e   : > { %v233_v2 = vld.sshfl [vmem:[#allocation1] sm:$0xff pattern:$0x75316420]  ;;  %v234_v3 = vld.sshfl [vmem:[#allocation1 + $0x8] sm:$0xff pattern:$0x75316420] }
  0x2f   : > { %v238_v4 = vsel %vm237_vm0, %v233_v2, -inf  ;;  %v245_v5 = vsel %vm237_vm0, %v234_v3, -inf  ;;  %p726_p13 = pnand %p725_p10, %p721_p6 }
  0x30   : > { %v239_v6 = vrot.slane %v238_v4, 4  ;;  %v246_v7 = vrot.slane %v245_v5, 4 }
  0x32   : > { %v240_v8 = vmax.f32 %v238_v4, %v239_v6  ;;  %v247_v9 = vmax.f32 %v245_v5, %v246_v7 }
  0x34   : > { %v241_v10 = vrot.slane %v240_v8, 2  ;;  %v248_v11 = vrot.slane %v247_v9, 2 }
  0x36   : > { %v242_v12 = vmax.f32 %v240_v8, %v241_v10  ;;  %v249_v13 = vmax.f32 %v247_v9, %v248_v11 }
  0x38   : > { %v243_v14 = vrot.slane %v242_v12, 1  ;;  %v250_v15 = vrot.slane %v249_v13, 1 }
  0x3a   : > { %v244_v16 = vmax.f32 %v242_v12, %v243_v14  ;;  %v251_v17 = vmax.f32 %v249_v13, %v250_v15 }
  0x3c   : > { %v254_v18 = vrot.slane %v251_v17, 4 }
  0x3e   : > { %v255_v19 = vsel %vm237_vm0, %v244_v16, %v254_v18 }
  0x3f   : > { %v902_v20 = vsub.f32 %v230_v1, %v255_v19 }
  0x41   : > { %v258_v21 = vmul.f32 1.442695, %v902_v20 }
  0x43   : > { %626 = vpow2.f32 %v258_v21 }
  0x49   : > { %v905_v22 = vpop.eup %626 }
  0x4a   : > { %261 = vst [vmem:[#allocation1] ss:$2 sm:$0xff] %v905_v22 }
  0x51   : > { %v262_v25 = vld.sshfl [vmem:[#allocation1] sm:$0xff pattern:$0x75316420]  ;;  %v263_v26 = vld.sshfl [vmem:[#allocation1 + $0x8] sm:$0xff pattern:$0x75316420] }
  0x52   : > { %325 = vst [vmem:[#allocation1] ss:$2 sm:$0xff] %v229_v24  ;;  %v273_v27 = vsel %vm237_vm0, %v263_v26, 0.0  ;;  %v266_v35 = vsel %vm237_vm0, %v262_v25, 0.0 }
  0x53   : > { %v274_v34 = vrot.slane %v273_v27, 4  ;;  %v267_v38 = vrot.slane %v266_v35, 4 }
  0x55   : > { %v275_v39 = vadd.f32 %v274_v34, %v273_v27  ;;  %v268_v43 = vadd.f32 %v267_v38, %v266_v35 }
  0x57   : > { %v276_v44 = vrot.slane %v275_v39, 2  ;;  %v269_v48 = vrot.slane %v268_v43, 2 }
  0x59   : > { %v326_v28 = vld.sshfl [vmem:[#allocation1] sm:$0xff pattern:$0x75316420]  ;;  %v327_v29 = vld.sshfl [vmem:[#allocation1 + $0x8] sm:$0xff pattern:$0x75316420]  ;;  %v277_v49 = vadd.f32 %v276_v44, %v275_v39  ;;  %v270_v53 = vadd.f32 %v269_v48, %v268_v43 }
  0x5a   : > { %v330_v30 = vsel %vm237_vm0, %v326_v28, -inf  ;;  %v337_v31 = vsel %vm237_vm0, %v327_v29, -inf }
  0x5b   : > { %v331_v32 = vrot.slane %v330_v30, 4  ;;  %v338_v33 = vrot.slane %v337_v31, 4  ;;  %v278_v54 = vrot.slane %v277_v49, 1  ;;  %v271_v58 = vrot.slane %v270_v53, 1 }
  0x5d   : > { %v332_v36 = vmax.f32 %v330_v30, %v331_v32  ;;  %v339_v37 = vmax.f32 %v337_v31, %v338_v33  ;;  %v279_v59 = vadd.f32 %v278_v54, %v277_v49  ;;  %v272_v60 = vadd.f32 %v271_v58, %v270_v53 }
  0x5f   : > { %v333_v40 = vrot.slane %v332_v36, 2  ;;  %v340_v41 = vrot.slane %v339_v37, 2  ;;  %vm299_vm1 = vweird.f32 %v279_v59  ;;  %v303_v17 = vand.u32 2147483647, %v279_v59 }
  0x60   : > { %v305_v18 = vand.u32 2147483648, %v279_v59  ;;  %vm285_vm4 = vweird.f32 %v272_v60  ;;  %v289_v29 = vand.u32 2147483647, %v272_v60  ;;  %v291_v30 = vand.u32 2147483648, %v272_v60 }
  0x61   : > { %v334_v42 = vmax.f32 %v332_v36, %v333_v40  ;;  %v341_v45 = vmax.f32 %v339_v37, %v340_v41  ;;  %vm304_vm6 = vcmp.eq.f32.partialorder %v303_v17, 8.507059e+37 }
  0x62   : > { %v306_v31 = vor.u32 1.1754944e-38, %v305_v18  ;;  %v292_v36 = vor.u32 1.1754944e-38, %v291_v30  ;;  %vm290_vm8 = vcmp.eq.f32.partialorder %v289_v29, 8.507059e+37 }
  0x63   : > { %v335_v46 = vrot.slane %v334_v42, 1  ;;  %v342_v47 = vrot.slane %v341_v45, 1 }
  0x65   : > { %v336_v50 = vmax.f32 %v334_v42, %v335_v46  ;;  %v343_v51 = vmax.f32 %v341_v45, %v342_v47 }
  0x67   : > { %v346_v52 = vrot.slane %v343_v51, 4 }
  0x69   : > { %v347_v55 = vsel %vm237_vm0, %v336_v50, %v346_v52 }
  0x6a   : > { %v915_v56 = vsub.f32 %v229_v24, %v347_v55 }
  0x6c   : > { %v350_v57 = vmul.f32 1.442695, %v915_v56 }
  0x6e   : > { %628 = vpow2.f32 %v350_v57 }
  0x6f   : > { %630 = vrcp.f32 %v279_v59 }
  0x70   : > { %632 = vrcp.f32 %v272_v60 }
  0x71   : > { %634 = vlog2.f32 %v279_v59 }
  0x72   : > { %636 = vlog2.f32 %v272_v60 }
  0x74   : > { %v629_v61 = vpop.eup %628 }
  0x75   : > { %353 = vst [vmem:[#allocation1] ss:$2 sm:$0xff] %v629_v61  ;;  %v631_v62 = vpop.eup %630 }
  0x76   : > { %v295_v63 = vmul.f32 %v631_v62, %v279_v59  ;;  %v633_v0 = vpop.eup %632  ;;  %vm300_vm2 = vweird.f32 %v631_v62 }
  0x77   : > { %v281_v5 = vmul.f32 %v633_v0, %v272_v60  ;;  %v635_v25 = vpop.eup %634  ;;  %vm920_vm3 = vmor %vm299_vm1, %vm300_vm2  ;;  %vm286_vm5 = vweird.f32 %v633_v0 }
  0x78   : > { %v296_v6 = vsub.f32 1.0, %v295_v63  ;;  %v317_v34 = vmul.f32 0.6931472, %v635_v25  ;;  %v637_v35 = vpop.eup %636  ;;  %vm287_vm7 = vmor %vm285_vm4, %vm286_vm5 }
  0x79   : > { %v282_v11 = vsub.f32 1.0, %v281_v5  ;;  %v315_v39 = vmul.f32 0.6931472, %v637_v35 }
  0x7a   : > { %v297_v12 = vmul.f32 %v631_v62, %v296_v6  ;;  %v320_v40 = vrot.slane %v317_v34, 4 }
  0x7b   : > { %v283_v19 = vmul.f32 %v633_v0, %v282_v11 }
  0x7c   : > { %v354_v1 = vld.sshfl [vmem:[#allocation1] sm:$0xff pattern:$0x75316420]  ;;  %v355_v2 = vld.sshfl [vmem:[#allocation1 + $0x8] sm:$0xff pattern:$0x75316420]  ;;  %v298_v21 = vadd.f32 %v631_v62, %v297_v12  ;;  %v321_v45 = vsel %vm237_vm0, %v315_v39, %v320_v40 }
  0x7d   : > { %v358_v3 = vsel %vm237_vm0, %v354_v1, 0.0  ;;  %v365_v4 = vsel %vm237_vm0, %v355_v2, 0.0  ;;  %v284_v32 = vadd.f32 %v633_v0, %v283_v19  ;;  %v323_v50 = vsub.f32 %v902_v20, %v321_v45 }
  0x7e   : > { %v359_v7 = vrot.slane %v358_v3, 4  ;;  %v366_v8 = vrot.slane %v365_v4, 4  ;;  %v302_v33 = vsel %vm920_vm3, %v631_v62, %v298_v21  ;;  %v402_v2 = vlaneseq }
  0x7f   : > { %v307_v37 = vsel %vm304_vm6, %v306_v31, %v302_v33  ;;  %v288_v38 = vsel %vm287_vm7, %v633_v0, %v284_v32 }
  0x80   : > { %v360_v9 = vadd.f32 %v359_v7, %v358_v3  ;;  %v367_v10 = vadd.f32 %v366_v8, %v365_v4  ;;  %v310_v42 = vrot.slane %v307_v37, 4  ;;  %v293_v44 = vsel %vm290_vm8, %v292_v36, %v288_v38 }
  0x81   : > { %v403_v3 = vshrl.u32 %v402_v2, 7  ;;  %v405_v4 = vand.u32 127, %v402_v2 }
  0x82   : > { %v361_v13 = vrot.slane %v360_v9, 2  ;;  %v368_v14 = vrot.slane %v367_v10, 2  ;;  %v311_v48 = vsel %vm237_vm0, %v293_v44, %v310_v42 }
  0x83   : > { %v313_v52 = vmul.f32 %v905_v22, %v311_v48  ;;  %vm406_vm9 = vcmp.eq.s32.totalorder %v403_v3, 0  ;;  %vm407_vm10 = vcmp.eq.s32.totalorder %v405_v4, 0 }
  0x84   : > { %v362_v15 = vadd.f32 %v361_v13, %v360_v9  ;;  %v369_v16 = vadd.f32 %v368_v14, %v367_v10  ;;  %vm408_vm11 = vmand %vm406_vm9, %vm407_vm10 }
  0x86   : > { %v363_v23 = vrot.slane %v362_v15, 1  ;;  %v370_v24 = vrot.slane %v369_v16, 1 }
  0x88   : > { %v364_v27 = vadd.f32 %v363_v23, %v362_v15  ;;  %v371_v28 = vadd.f32 %v370_v24, %v369_v16 }
  0x8a   : > { %638 = vlog2.f32 %v364_v27 }
  0x8b   : > { %640 = vlog2.f32 %v371_v28 }
  0x90   : > { %v639_v41 = vpop.eup %638 }
  0x91   : > { %v641_v43 = vpop.eup %640  ;;  %v373_v46 = vmul.f32 0.6931472, %v639_v41 }
  0x92   : > { %v375_v47 = vmul.f32 0.6931472, %v641_v43 }
  0x94   : > { %v378_v49 = vrot.slane %v375_v47, 4 }
  0x96   : > { %v379_v51 = vsel %vm237_vm0, %v373_v46, %v378_v49 }
  0x97   : > { %v381_v53 = vsub.f32 %v915_v56, %v379_v51 }
  0x99   : > { %v382_v54 = vsub.f32 %v323_v50, %v381_v53 }
  0x9b   : > { %v383_v55 = vmul.f32 %v382_v54, %v313_v52 }
  0x9d   : > { %385 = vst [vmem:[#allocation1] ss:$2 sm:$0xff] %v383_v55 }
  0xa4   : > { %v386_v57 = vld.sshfl [vmem:[#allocation1] sm:$0xff pattern:$0x75316420]  ;;  %v387_v58 = vld.sshfl [vmem:[#allocation1 + $0x8] sm:$0xff pattern:$0x75316420] }
  0xa5   : > { %v390_v59 = vsel %vm237_vm0, %v386_v57, 0.0  ;;  %v391_v60 = vsel %vm237_vm0, %v387_v58, 0.0 }
  0xa6   : > { %v392_v61 = vadd.f32 %v391_v60, %v390_v59 }
  0xa8   : > { %393 = vadd.xlane.f32.xlu0 %v392_v61 }
 0x11b   : > { %v394_v20 = vpop.xlane.xlu0 %393 }
 0x11c   : > { %v395_v62 = vrot.slane %v394_v20, 4 }
 0x11e   : > { %v396_v63 = vadd.f32 %v395_v62, %v394_v20 }
 0x120   : > { %v397_v0 = vrot.slane %v396_v63, 2 }
 0x122   : > { %v398_v22 = vadd.f32 %v397_v0, %v396_v63 }
 0x124   : > { %v399_v1 = vrot.slane %v398_v22, 1 }
 0x126   : > { %v400_v56 = vadd.f32 %v399_v1, %v398_v22 }
 0x128   : > { %557 = vpush %v400_v56 }
 0x159   : > { %s558_s15 = spop %557 }
 0x15a   : > { %v409_v5 = vstv %s558_s15 }
 0x15b   : > { %v410_v6 = vsel %vm408_vm11, %v409_v5, 0.0 }
 0x15c   : > { %411 = vst [vmem:[%s223_s6] sm:$0xff] %v410_v6 }
 0x15d   : > { %729 = shalt.err (!%p726_p13)
}
 0x15e   : > { %563 = dma.vmem_to_hbm [thread:$0]  (%p856_p9), %s427_s7, 128, %s429_s8, %s413_s16  }
 0x15f PF: > { %s440_s19 = sand.u32 1, %s768_s9   ;;  %p573_p0 = pnand %p540_p12, %p863_p11 }
 0x160   : > { %s441_s25 = scalar_lea.sflag [#allocation4], %s440_s19 }
 0x161   : > { %p574_p1 = pneg %p573_p0 }
 0x163   : > { %763 = dma.done.wait (%p574_p1), %s441_s25, 128  }
 0x164   : > { %765 = vsyncadd (%p574_p1), %s441_s25, 4294967168  ;;  %s21_s14 = sadd.s32 1, %s788_s14   ;;  %s982_s9 = smov %s772_s10 }
 0x165   : > { %p18_p2 = scmp.ge.s32.totalorder %s21_s14, 4   ;;  %s983_s10 = smov %s776_s11 }
 0x166   : > { %s984_s11 = smov %s861_s23  ;;  %s985_s12 = smov %s784_s13 }
 0x167   : > { %s986_s13 = smov %s988_s17  ;;  %20 = sbr.rel (!%p18_p2) target bundleno = 8 (0x8), region = 86 }
 0x16c   :  { %447 = vsyncpa [#allocation3], 1 }
 0x16d   :  { %449 = vsyncpa [#allocation3 + $0x1], 1 }
 0x16e   :  { %450 = vsyncpa [#allocation6], 1 }
 0x16f   :  { %452 = vsyncpa [#allocation6 + $0x1], 1 }
 0x170   :  { %453 = vsyncpa [#allocation4], 1 }
 0x171   :  { %455 = vsyncpa [#allocation4 + $0x1], 1 }

</bundles_post_ra>
